<compile_context>
chip_gen: v5e
topology: v5e:2x2
jax: 0.10.0
libtpu: 0.0.40
codegen_flags: <defaults>
</compile_context>

<pallas_src>
import functools

import jax
import jax.numpy as jnp
from jax import lax
from jax.experimental import pallas as pl
from jax.experimental.pallas import tpu as pltpu

KH = KW = 3   # kernel_size
PAD = 1       # padding (stride fixed to 1, channel multiplier 1)


def _dwconv_kernel(x_ref, w_ref, b_ref, o_ref, *, W, HW):
    """One (batch, channel-block) slab per grid step, image flattened on lanes.

    x_ref : (C_blk, H*W) VMEM  input slab (channels on sublanes, pixels on lanes)
    w_ref : (C_blk, 9)   VMEM  per-channel 3x3 taps, [c, kh*3 + kw]
    b_ref : (C_blk, 1)   VMEM  per-channel bias
    o_ref : (C_blk, H*W) VMEM  output slab
    """
    x = x_ref[...].astype(jnp.float32)          # bf16-storage-friendly load
    w = w_ref[...]                              # (C_blk, 9) f32

    cb = x.shape[0]
    lane = lax.broadcasted_iota(jnp.int32, (cb, HW), 1)
    col = lane % W                              # w-coordinate of each lane

    # kw = 0 / 2 taps read x[h, w-1] / x[h, w+1].  Rolls are circular along the
    # flat axis, so mask the image left/right edge columns back to zero
    # (this also kills the cross-row wrap of the +/-1 shifts).
    x_l = jnp.where(col == 0, 0.0, pltpu.roll(x, shift=1, axis=1))        # x[i-1]
    x_r = jnp.where(col == W - 1, 0.0, pltpu.roll(x, shift=HW - 1, axis=1))  # x[i+1]

    def row_sum(kh):
        # Partial sum of kernel row `kh`, evaluated on the *input* row.
        return (x_l * w[:, 3 * kh + 0:3 * kh + 1]
                + x * w[:, 3 * kh + 1:3 * kh + 2]
                + x_r * w[:, 3 * kh + 2:3 * kh + 3])

    # kh = 1 (center row); fold bias into the accumulator init.
    acc = row_sum(1) + b_ref[...]
    # kh = 0 reads input row h-1: shift partial sum down by W, zero at h == 0.
    acc = acc + jnp.where(lane < W, 0.0,
                          pltpu.roll(row_sum(0), shift=W, axis=1))
    # kh = 2 reads input row h+1: shift up by W, zero at h == H-1.
    acc = acc + jnp.where(lane >= HW - W, 0.0,
                          pltpu.roll(row_sum(2), shift=HW - W, axis=1))

    o_ref[...] = acc.astype(o_ref.dtype)


def _choose_c_blk(N, C, HW, itemsize):
    """Pick a channel block: ~2 MiB slabs (v7x-safe), legal sublane dim."""
    target_bytes = 2 * 1024 * 1024
    cap = max(1, target_bytes // (HW * itemsize))
    if cap >= C:
        c_blk = C
    else:
        c_blk = C  # fallback: whole channel dim (always a legal block)
        for cand in range(int(min(cap, C)), 0, -1):
            # block's second-to-last dim must be a multiple of 8 (or == C)
            if C % cand == 0 and cand % 8 == 0:
                c_blk = cand
                break
    # v7x has 2 TensorCores sharded over parallel grid axes: avoid a 1-step
    # grid when channels can be split without breaking the (8, 128) rule.
    while N * (C // c_blk) < 2 and c_blk % 16 == 0:
        c_blk //= 2
    return c_blk


def dwconv(x_nchw, weight, bias):
    """Depthwise conv, groups == in_channels, channel multiplier 1.

    x_nchw : (N, C, H, W)     float32 (NCHW kept; only free reshapes used)
    weight : (C, 1, KH, KW)   PyTorch depthwise layout
    bias   : (C,)
    returns (N, C, H, W)
    """
    N, C, H, W = x_nchw.shape
    assert weight.shape == (C, 1, KH, KW)
    HW = H * W

    # Free trailing-dim reshape: same HBM layout, lane-dense blocks.
    x_flat = x_nchw.reshape(N, C, HW)
    w_tab = weight.reshape(C, KH * KW).astype(jnp.float32)   # [c, kh*3 + kw]
    b_col = bias.reshape(C, 1).astype(jnp.float32)

    c_blk = _choose_c_blk(N, C, HW, x_nchw.dtype.itemsize)

    # Per-step VMEM: double-buffered in/out slabs + ~5 live f32 temporaries.
    block_bytes = c_blk * HW * 4
    vmem_limit = int(min(max(12 * block_bytes, 16 * 1024 * 1024),
                         48 * 1024 * 1024))

    out_flat = pl.pallas_call(
        functools.partial(_dwconv_kernel, W=W, HW=HW),
        out_shape=jax.ShapeDtypeStruct((N, C, HW), x_nchw.dtype),
        grid=(N, C // c_blk),
        in_specs=[
            pl.BlockSpec((None, c_blk, HW), lambda n, cb: (n, cb, 0)),
            pl.BlockSpec((c_blk, KH * KW), lambda n, cb: (cb, 0)),
            pl.BlockSpec((c_blk, 1), lambda n, cb: (cb, 0)),
        ],
        out_specs=pl.BlockSpec((None, c_blk, HW), lambda n, cb: (n, cb, 0)),
        compiler_params=pltpu.CompilerParams(
            dimension_semantics=("parallel", "parallel"),
            vmem_limit_bytes=vmem_limit,
        ),
    )(x_flat, w_tab, b_col)

    return out_flat.reshape(N, C, H, W)


def _reference(x_nchw, weight, bias):
    # Pure-JAX reference: grouped conv with feature_group_count = C.
    C = x_nchw.shape[1]
    out = lax.conv_general_dilated(
        x_nchw, weight,
        window_strides=(1, 1),
        padding=((PAD, PAD), (PAD, PAD)),
        dimension_numbers=("NCHW", "OIHW", "NCHW"),
        feature_group_count=C,
    )
    return out + bias[None, :, None, None]


if __name__ == "__main__":
    key = jax.random.PRNGKey(0)
    kx, kw_key, kb = jax.random.split(key, 3)

    N, C, H, W = 2, 4, 16, 16
    x = jax.random.normal(kx, (N, C, H, W), dtype=jnp.float32)
    weight = jax.random.normal(kw_key, (C, 1, KH, KW), dtype=jnp.float32) * 0.1
    bias = jax.random.normal(kb, (C,), dtype=jnp.float32) * 0.1

    out = dwconv(x, weight, bias)
    out = jax.block_until_ready(out)

    ref = _reference(x, weight, bias)
    assert out.shape == (N, C, H, W)
    assert jnp.allclose(out, ref, atol=1e-4, rtol=1e-4), "mismatch vs reference"

    print("KERNEL_OK")
</pallas_src>

<mosaic_0001>
module attributes {stable_mosaic.version = 11 : i64} {
  func.func @_dwconv_kernel(%arg0: i32, %arg1: i32, %arg2: memref<1x4x256xf32, #tpu.memory_space<vmem>>, %arg3: memref<4x9xf32, #tpu.memory_space<vmem>>, %arg4: memref<4x1xf32, #tpu.memory_space<vmem>>, %arg5: memref<1x4x256xf32, #tpu.memory_space<vmem>>) attributes {dimension_semantics = [#tpu.dimension_semantics<parallel>, #tpu.dimension_semantics<parallel>], iteration_bounds = array<i64: 2, 1>, scalar_prefetch = 0 : i64, scratch_operands = 0 : i64, tpu.core_type = #tpu.core_type<tc>, window_params = [{transform_indices = @transform_0, window_bounds = array<i64: 1, 4, 256>}, {transform_indices = @transform_1, window_bounds = array<i64: 4, 9>}, {transform_indices = @transform_2, window_bounds = array<i64: 4, 1>}, {transform_indices = @transform_3, window_bounds = array<i64: 1, 4, 256>}]} {
    %c0 = arith.constant 0 : index
    %c0_0 = arith.constant 0 : index
    %c0_1 = arith.constant 0 : index
    %0 = vector.load %arg2[%c0, %c0_0, %c0_1] : memref<1x4x256xf32, #tpu.memory_space<vmem>>, vector<1x4x256xf32>
    %1 = vector.shape_cast %0 : vector<1x4x256xf32> to vector<4x256xf32>
    %c0_2 = arith.constant 0 : index
    %c0_3 = arith.constant 0 : index
    %2 = vector.load %arg3[%c0_2, %c0_3] : memref<4x9xf32, #tpu.memory_space<vmem>>, vector<4x9xf32>
    %3 = tpu.iota {dimensions = array<i32: 1>} : vector<4x256xi32>
    %c16_i32 = arith.constant 16 : i32
    %c0_i32 = arith.constant 0 : i32
    %4 = arith.cmpi eq, %c16_i32, %c0_i32 : i32
    %c1_i32 = arith.constant 1 : i32
    %5 = arith.select %4, %c1_i32, %c16_i32 : i32
    %6 = vector.broadcast %5 : i32 to vector<4x256xi32>
    %7 = arith.remsi %3, %6 : vector<4x256xi32>
    %c0_i32_4 = arith.constant 0 : i32
    %8 = vector.broadcast %c0_i32_4 : i32 to vector<4x256xi32>
    %9 = arith.cmpi ne, %7, %8 : vector<4x256xi32>
    %c0_i32_5 = arith.constant 0 : i32
    %10 = vector.broadcast %c0_i32_5 : i32 to vector<4x256xi32>
    %11 = arith.cmpi slt, %7, %10 : vector<4x256xi32>
    %c0_i32_6 = arith.constant 0 : i32
    %12 = arith.cmpi slt, %5, %c0_i32_6 : i32
    %13 = vector.broadcast %12 : i1 to vector<4x256xi1>
    %14 = vector.broadcast %13 : vector<4x256xi1> to vector<4x256xi1>
    %15 = arith.xori %11, %14 : vector<4x256xi1>
    %16 = arith.andi %15, %9 : vector<4x256xi1>
    %17 = vector.broadcast %5 : i32 to vector<4x256xi32>
    %18 = arith.addi %7, %17 : vector<4x256xi32>
    %19 = arith.select %16, %18, %7 : vector<4x256xi1>, vector<4x256xi32>
    %c0_i32_7 = arith.constant 0 : i32
    %20 = vector.broadcast %c0_i32_7 : i32 to vector<4x256xi32>
    %21 = arith.cmpi eq, %19, %20 : vector<4x256xi32>
    %c1_i32_8 = arith.constant 1 : i32
    %22 = tpu.dynamic_rotate %1 by %c1_i32_8 dim 1 : vector<4x256xf32>, i32 -> vector<4x256xf32>
    %cst = arith.constant 0.000000e+00 : f32
    %23 = vector.broadcast %cst : f32 to vector<4x256xf32>
    %24 = arith.select %21, %23, %22 : vector<4x256xi1>, vector<4x256xf32>
    %c15_i32 = arith.constant 15 : i32
    %25 = vector.broadcast %c15_i32 : i32 to vector<4x256xi32>
    %26 = arith.cmpi eq, %19, %25 : vector<4x256xi32>
    %c255_i32 = arith.constant 255 : i32
    %27 = tpu.dynamic_rotate %1 by %c255_i32 dim 1 : vector<4x256xf32>, i32 -> vector<4x256xf32>
    %cst_9 = arith.constant 0.000000e+00 : f32
    %28 = vector.broadcast %cst_9 : f32 to vector<4x256xf32>
    %29 = arith.select %26, %28, %27 : vector<4x256xi1>, vector<4x256xf32>
    %30 = vector.extract_strided_slice %2 {offsets = [0, 3], sizes = [4, 1], strides = [1, 1]} : vector<4x9xf32> to vector<4x1xf32>
    %31 = vector.broadcast %30 : vector<4x1xf32> to vector<4x256xf32>
    %32 = arith.mulf %24, %31 : vector<4x256xf32>
    %33 = vector.extract_strided_slice %2 {offsets = [0, 4], sizes = [4, 1], strides = [1, 1]} : vector<4x9xf32> to vector<4x1xf32>
    %34 = vector.broadcast %33 : vector<4x1xf32> to vector<4x256xf32>
    %35 = arith.mulf %1, %34 : vector<4x256xf32>
    %36 = arith.addf %32, %35 : vector<4x256xf32>
    %37 = vector.extract_strided_slice %2 {offsets = [0, 5], sizes = [4, 1], strides = [1, 1]} : vector<4x9xf32> to vector<4x1xf32>
    %38 = vector.broadcast %37 : vector<4x1xf32> to vector<4x256xf32>
    %39 = arith.mulf %29, %38 : vector<4x256xf32>
    %40 = arith.addf %36, %39 : vector<4x256xf32>
    %c0_10 = arith.constant 0 : index
    %c0_11 = arith.constant 0 : index
    %41 = vector.load %arg4[%c0_10, %c0_11] : memref<4x1xf32, #tpu.memory_space<vmem>>, vector<4x1xf32>
    %42 = vector.broadcast %41 : vector<4x1xf32> to vector<4x256xf32>
    %43 = arith.addf %40, %42 : vector<4x256xf32>
    %c16_i32_12 = arith.constant 16 : i32
    %44 = vector.broadcast %c16_i32_12 : i32 to vector<4x256xi32>
    %45 = arith.cmpi slt, %3, %44 : vector<4x256xi32>
    %46 = vector.extract_strided_slice %2 {offsets = [0, 0], sizes = [4, 1], strides = [1, 1]} : vector<4x9xf32> to vector<4x1xf32>
    %47 = vector.broadcast %46 : vector<4x1xf32> to vector<4x256xf32>
    %48 = arith.mulf %24, %47 : vector<4x256xf32>
    %49 = vector.extract_strided_slice %2 {offsets = [0, 1], sizes = [4, 1], strides = [1, 1]} : vector<4x9xf32> to vector<4x1xf32>
    %50 = vector.broadcast %49 : vector<4x1xf32> to vector<4x256xf32>
    %51 = arith.mulf %1, %50 : vector<4x256xf32>
    %52 = arith.addf %48, %51 : vector<4x256xf32>
    %53 = vector.extract_strided_slice %2 {offsets = [0, 2], sizes = [4, 1], strides = [1, 1]} : vector<4x9xf32> to vector<4x1xf32>
    %54 = vector.broadcast %53 : vector<4x1xf32> to vector<4x256xf32>
    %55 = arith.mulf %29, %54 : vector<4x256xf32>
    %56 = arith.addf %52, %55 : vector<4x256xf32>
    %c16_i32_13 = arith.constant 16 : i32
    %57 = tpu.dynamic_rotate %56 by %c16_i32_13 dim 1 : vector<4x256xf32>, i32 -> vector<4x256xf32>
    %cst_14 = arith.constant 0.000000e+00 : f32
    %58 = vector.broadcast %cst_14 : f32 to vector<4x256xf32>
    %59 = arith.select %45, %58, %57 : vector<4x256xi1>, vector<4x256xf32>
    %60 = arith.addf %43, %59 : vector<4x256xf32>
    %c240_i32 = arith.constant 240 : i32
    %61 = vector.broadcast %c240_i32 : i32 to vector<4x256xi32>
    %62 = arith.cmpi sge, %3, %61 : vector<4x256xi32>
    %63 = vector.extract_strided_slice %2 {offsets = [0, 6], sizes = [4, 1], strides = [1, 1]} : vector<4x9xf32> to vector<4x1xf32>
    %64 = vector.broadcast %63 : vector<4x1xf32> to vector<4x256xf32>
    %65 = arith.mulf %24, %64 : vector<4x256xf32>
    %66 = vector.extract_strided_slice %2 {offsets = [0, 7], sizes = [4, 1], strides = [1, 1]} : vector<4x9xf32> to vector<4x1xf32>
    %67 = vector.broadcast %66 : vector<4x1xf32> to vector<4x256xf32>
    %68 = arith.mulf %1, %67 : vector<4x256xf32>
    %69 = arith.addf %65, %68 : vector<4x256xf32>
    %70 = vector.extract_strided_slice %2 {offsets = [0, 8], sizes = [4, 1], strides = [1, 1]} : vector<4x9xf32> to vector<4x1xf32>
    %71 = vector.broadcast %70 : vector<4x1xf32> to vector<4x256xf32>
    %72 = arith.mulf %29, %71 : vector<4x256xf32>
    %73 = arith.addf %69, %72 : vector<4x256xf32>
    %c240_i32_15 = arith.constant 240 : i32
    %74 = tpu.dynamic_rotate %73 by %c240_i32_15 dim 1 : vector<4x256xf32>, i32 -> vector<4x256xf32>
    %cst_16 = arith.constant 0.000000e+00 : f32
    %75 = vector.broadcast %cst_16 : f32 to vector<4x256xf32>
    %76 = arith.select %62, %75, %74 : vector<4x256xi1>, vector<4x256xf32>
    %77 = arith.addf %60, %76 : vector<4x256xf32>
    %c0_17 = arith.constant 0 : index
    %c0_18 = arith.constant 0 : index
    %c0_19 = arith.constant 0 : index
    %78 = vector.load %arg5[%c0_17, %c0_18, %c0_19] : memref<1x4x256xf32, #tpu.memory_space<vmem>>, vector<1x4x256xf32>
    %79 = vector.shape_cast %78 : vector<1x4x256xf32> to vector<4x256xf32>
    %80 = vector.shape_cast %77 : vector<4x256xf32> to vector<1x4x256xf32>
    tpu.vector_store %arg5[%c0_17, %c0_18, %c0_19], %80 {strides = array<i32>} : memref<1x4x256xf32, #tpu.memory_space<vmem>>, vector<1x4x256xf32>,
    return
  }
  func.func @transform_0(%arg0: i32, %arg1: i32) -> (i32, i32, i32) {
    %c0_i32 = arith.constant 0 : i32
    %c0_i32_0 = arith.constant 0 : i32
    return %arg0, %arg1, %c0_i32 : i32, i32, i32
  }
  func.func @transform_1(%arg0: i32, %arg1: i32) -> (i32, i32) {
    %c0_i32 = arith.constant 0 : i32
    %c0_i32_0 = arith.constant 0 : i32
    return %arg1, %c0_i32 : i32, i32
  }
  func.func @transform_2(%arg0: i32, %arg1: i32) -> (i32, i32) {
    %c0_i32 = arith.constant 0 : i32
    %c0_i32_0 = arith.constant 0 : i32
    return %arg1, %c0_i32 : i32, i32
  }
  func.func @transform_3(%arg0: i32, %arg1: i32) -> (i32, i32, i32) {
    %c0_i32 = arith.constant 0 : i32
    %c0_i32_0 = arith.constant 0 : i32
    return %arg0, %arg1, %c0_i32 : i32, i32, i32
  }
}

</mosaic_0001>

<bundles_post_ra>
// kernel: tpu_custom_call.1
= control target key start
LH: loop header
LB: loop body
LE: loop exit
PB: predicated region body
PF: predicated region fallthrough
CT: control target
= control target key end

     0   :  { %8 = vsyncpa [#allocation3], 0  ;;  %s973_s0 = inlined_call_operand.hbm [shape: f32[2,4,256], index: 0, kind: input, shape index: {}]   ;;  %s974_s1 = inlined_call_operand.vmem [shape: f32[4,9], index: 1, kind: input, shape index: {}]   ;;  %s975_s2 = inlined_call_operand.vmem [shape: f32[4,1], index: 2, kind: input, shape index: {}]   ;;  %s976_s3 = inlined_call_operand.hbm [shape: f32[2,4,256], index: 3, kind: output, shape index: {}]  }
   0x1   :  { %10 = vsyncpa [#allocation3 + $0x1], 0 }
   0x2   :  { %11 = vsyncpa [#allocation4], 0 }
   0x3   :  { %13 = vsyncpa [#allocation4 + $0x1], 0  ;;  %s824_s12 = smov 0   ;;  %s826_s13 = smov 0  }
   0x4   :  { %s828_s14 = smov 0   ;;  %s830_s15 = smov 0  }
   0x5   :  { %s832_s16 = smov 0   ;;  %s834_s17 = smov 0  }
   0x6 LB: > { %s570_s18 = sadd.s32 4294967295, %s788_s17   ;;  %s571_s19 = sadd.s32 4294967294, %s788_s17   ;;  %s788_s17 = sphi %s834_s17, %s19_s17   ;;  %s784_s16 = sphi %s832_s16, %s985_s16   ;;  %s780_s15 = sphi %s830_s15, %s984_s15   ;;  %s776_s14 = sphi %s828_s14, %s983_s14   ;;  %s772_s13 = sphi %s826_s13, %s982_s13   ;;  %s768_s12 = sphi %s824_s12, %s981_s12  }
   0x7   : > { %s31_s20 = sadd.s32 1, %s784_s16  ;;  %s40_s21 = sadd.s32 1, %s776_s14 }
   0x8   : > { %p33_p0 = scmp.ge.s32.totalorder %s31_s20, 2  ;;  %p47_p1 = scmp.ne.s32.totalorder %s776_s14, %s772_s13 }
   0x9   : > { %p48_p2 = scmp.eq.s32.totalorder %s788_s17, 0  ;;  %p53_p3 = scmp.ne.s32.totalorder %s772_s13, %s768_s12 }
   0xa   : > { %s987_s20 = smov (%p33_p0, %s31_s20), 0  ;;  %p54_p5 = scmp.eq.s32.totalorder %s570_s18, 0 }
   0xb   : > { %p865_p4 = por %p48_p2, %p47_p1  ;;  %s35_s23 = ssub.s32 %s784_s16, %s987_s20 }
   0xc   : > { %p131_p6 = scmp.eq.s32.totalorder %s570_s18, 1  ;;  %p38_p7 = scmp.eq.s32.totalorder %s35_s23, 0 }
   0xd   : > { %p871_p8 = por %p54_p5, %p53_p3  ;;  %p137_p10 = scmp.eq.s32.totalorder %s571_s19, 1 }
   0xe   : > { %p875_p9 = por %p131_p6, %p47_p1  ;;  %p575_p12 = scmp.ge.s32.totalorder %s788_s17, 2 }
   0xf   : > { %s880_s26 = scalar_select %p38_p7, %s776_s14, %s40_s21  }
  0x10   : > { %p882_p11 = por %p137_p10, %p53_p3  ;;  %p601_p13 = scmp.lt.s32.totalorder %s788_s17, 2 }
  0x11   : > { %s171_s28 = sand.u32 1, %s776_s14   ;;  %s587_s30 = sshll.u32 %s784_s16, 3 }
  0x12   : > { %s576_s29 = sshll.u32 %s171_s28, 3  ;;  %s182_s6 = scalar_lea.hbm %s973_s0, %s587_s30 }
  0x13   : > { %s175_s7 = scalar_lea.vmem [#allocation2], %s576_s29  ;;  %s184_s9 = sshll.u32 %s182_s6, 4  ;;  %s185_s9 = int_to_ptr.hbm [resolvable:$true] %s184_s9 }
  0x14   : > { %s186_s8 = sshll.u32 %s175_s7, 4  ;;  %p594_p0 = pnand %p601_p13, %p865_p4  ;;  %s187_s8 = int_to_ptr.vmem [resolvable:$true] %s186_s8 }
  0x15   : > { %p579_p1 = scmp.ge.s32.totalorder %s788_s17, 1  ;;  %p191_p2 = scmp.lt.s32.totalorder %s788_s17, 3 }
  0x16   : > { %s172_s10 = scalar_lea.sflag [#allocation3], %s171_s28 }
  0x17   : > { %596 = dma.hbm_to_vmem [thread:$0]  (!%p594_p0), %s185_s9, 128, %s187_s8, %s172_s10  }
  0x18   : > { %p192_p3 = pnand %p579_p1, %p191_p2 }
  0x19   : > { %s898_s11 = sand.u32 (!%p192_p3), 1, %s772_s13  }
  0x1a   : > { %195 = sbr.rel (%p192_p3) target bundleno = 310 (0x136), region = 32  ;;  %s580_s18 = sshll.u32 (!%p192_p3), %s898_s11, 3 }
  0x1b   : > { %s198_s19 = scalar_lea.sflag (!%p192_p3), [#allocation3], %s898_s11  ;;  %s201_s21 = scalar_lea.vmem (!%p192_p3), [#allocation2], %s580_s18 }
  0x1f   : > { %759 = dma.done.wait (%p871_p8), %s198_s19, 128  }
  0x20   : > { %761 = vsyncadd (%p871_p8), %s198_s19, 4294967168  ;;  %v790_v0 = vmov 7   ;;  %v791_v1 = vmov 4   ;;  %v792_v2 = vmov 0   ;;  %v242_v3 = vld [vmem:[%s974_s1] sm:$0xf]  ;;  %v243_v23 = vlaneseq }
  0x21   : > { %667 = vset.pattern.permute.xlu1 %v790_v0  ;;  %665 = vset.pattern.permute.xlu0 %v791_v1  ;;  %v911_v4 = vld [vmem:[%s201_s21] sm:$0xff]  ;;  %v793_v7 = vmov 1   ;;  %s794_s24 = smov 1   ;;  %v795_v8 = vmov 2   ;;  %v796_v9 = vmov 8   ;;  %s797_s28 = smov 127  }
  0x22   : > { %668 = vset.pattern.permute.xlu2 %v792_v2  ;;  %395 = vperm.xlu1 %667, %v242_v3   ;;  %273 = vst [vmem:[#allocation1] ss:$2 sm:$0xff] %v911_v4  ;;  %v798_v12 = vmov 6   ;;  %v335_v13 = vld [vmem:[%s975_s2] sm:$0xf]  ;;  %v799_v14 = vmov 3  }
  0x23   : > { %311 = vperm.xlu0 %665, %v242_v3   ;;  %346 = vperm.xlu2 %668, %v242_v3   ;;  %v800_v15 = vmov 5   ;;  %v801_v17 = vmov 839922192   ;;  %v919_v26 = vand.u32 127, %v243_v23  ;;  %s802_s4 = smov 16   ;;  %s803_s5 = smov 112  }
  0x24   : > { %v314_v18 = vunpack.c.l.s4 %v801_v17  ;;  %s588_s6 = sshll.u32 %s780_s15, 3  ;;  %s232_s15 = scalar_lea.vmem [#allocation5], %s580_s18  ;;  %vm433_vm9 = vcmask 1043456  }
  0x25   : > { %v922_v28 = vadd.s32 128, %v919_v26  ;;  %v250_v35 = vand.u32 15, %v919_v26  ;;  %vm282_vm0 = vcmp.lt.s32.totalorder %v919_v26, 1  ;;  %vm298_vm3 = vcmp.lt.s32.totalorder %v919_v26, 127  ;;  %s451_s9 = scalar_lea.hbm %s976_s3, %s588_s6  ;;  %s453_s10 = sshll.u32 %s232_s15, 4  ;;  %s454_s10 = int_to_ptr.vmem [resolvable:$true] %s453_s10 }
  0x26   : > { %v315_v19 = vunpack.c.0.s8 %v314_v18  ;;  %vm343_vm6 = vcmp.lt.s32.totalorder %v919_v26, 16  ;;  %vm423_vm7 = vcmp.lt.s32.totalorder %v919_v26, 112  ;;  %s455_s19 = sshll.u32 %s451_s9, 4  ;;  %s438_s21 = scalar_lea.sflag [#allocation4], %s898_s11  ;;  %s456_s19 = int_to_ptr.hbm [resolvable:$true] %s455_s19 }
  0x27   : > { %v257_v36 = vand.u32 15, %v922_v28  ;;  %vm270_vm1 = vcmp.eq.s32.totalorder %v250_v35, 0  ;;  %vm287_vm4 = vcmp.eq.s32.totalorder %v250_v35, 15  ;;  %vm387_vm8 = vcmp.ge.s32.totalorder %v922_v28, 240  ;;  %s720_s22 = sshra.s32 %s456_s19, 4  ;;  %s726_s18 = scalar_lea.hbm %s976_s3, 16  ;;  %s721_s22 = int_to_ptr.hbm [resolvable:$true] %s720_s22 }
  0x28   : > { %s722_s23 = scalar_lea.hbm %s721_s22, 8  ;;  %p727_p7 = scmp.lt.s32.totalorder %s721_s22, %s976_s3 }
  0x29   : > { %v274_v5 = vld.sshfl [vmem:[#allocation1] sm:$0xff pattern:$0x75316420]  ;;  %v275_v6 = vld.sshfl [vmem:[#allocation1 + $0x8] sm:$0xff pattern:$0x75316420]  ;;  %p723_p4 = scmp.ne.s32.totalorder %s721_s22, %s722_s23  ;;  %p728_p8 = scmp.lt.s32.totalorder %s726_s18, %s722_s23 }
  0x2a   : > { %278 = vrot.lane.b32.xlu1 %v274_v5, %s794_s24  ;;  %289 = vst [vmem:[#allocation1] ss:$2 sm:$0xff] %v911_v4  ;;  %vm271_vm2 = vcmp.eq.s32.totalorder %v257_v36, 0  ;;  %vm288_vm5 = vcmp.eq.s32.totalorder %v257_v36, 15 }
  0x2b   : > { %666 = vset.pattern.permute.xlu0 %v793_v7  ;;  %280 = vrot.lane.b32.xlu2 %v275_v6, %s794_s24  ;;  %p724_p5 = pnand %p723_p4, %p875_p9  ;;  %p729_p10 = por %p728_p8, %p727_p7 }
  0x2c   : > { %352 = vperm.xlu0 %666, %v242_v3   ;;  %670 = vset.pattern.permute.xlu1 %v795_v8 }
  0x2d   : > { %671 = vset.pattern.permute.xlu2 %v796_v9  ;;  %p725_p6 = pneg %p724_p5 }
  0x2f   : > { %p730_p13 = pnand %p729_p10, %p725_p6 }
  0x31   : > { %v291_v10 = vld.sshfl [vmem:[#allocation1 + $0x8] sm:$0xff pattern:$0x75316420]  ;;  %v290_v11 = vld.sshfl [vmem:[#allocation1] sm:$0xff pattern:$0x75316420] }
  0x32   : > { %296 = vrot.lane.b32.xlu1 %v291_v10, %s797_s28 }
  0x33   : > { %294 = vrot.lane.b32.xlu2 %v290_v11, %s797_s28 }
  0x34   : > { %669 = vset.pattern.permute.xlu0 %v798_v12 }
  0x35   : > { %389 = vperm.xlu0 %669, %v242_v3  }
  0x3a   : > { %369 = vperm.xlu1 %670, %v242_v3  }
  0x3b   : > { %412 = vperm.xlu2 %671, %v242_v3  }
  0x3d   : > { %674 = vset.pattern.permute.xlu0 %v792_v2 }
  0x3e   : > { %338 = vperm.xlu0 %674, %v335_v13  }
  0x42   : > { %672 = vset.pattern.permute.xlu1 %v799_v14 }
  0x43   : > { %305 = vperm.xlu1 %672, %v242_v3   ;;  %673 = vset.pattern.permute.xlu2 %v800_v15 }
  0x44   : > { %328 = vperm.xlu2 %673, %v242_v3  }
  0x46   : > { %675 = vset.pattern.permute.xlu0 %v796_v9 }
  0x7d   : > { %v347_v16 = vpop.permute.xlu2 %346 }
  0x85   : > { %v281_v24 = vpop.permute.xlu2 %280 }
  0x8d   : > { %v295_v34 = vpop.permute.xlu2 %294 }
  0x94   : > { %v396_v20 = vpop.permute.xlu1 %395 }
  0x95   : > { %v312_v21 = vpop.permute.xlu0 %311  ;;  %v400_v37 = vperm.slane %v396_v20, %v315_v19  ;;  %v413_v50 = vpop.permute.xlu2 %412 }
  0x96   : > { %v316_v22 = vperm.slane %v312_v21, %v315_v19 }
  0x97   : > { %v402_v41 = vmul.f32 %v400_v37, %v911_v4 }
  0x98   : > { %v318_v25 = vmul.f32 %v316_v22, %v911_v4 }
  0x9a   : > { %320 = vst [vmem:[#allocation1] ss:$2 sm:$0xff] %v318_v25 }
  0x9c   : > { %v279_v27 = vpop.permute.xlu1 %278 }
  0x9d   : > { %v283_v39 = vsel %vm282_vm0, %v279_v27, %v281_v24  ;;  %v284_v40 = vsel %vm282_vm0, %v281_v24, %v279_v27 }
  0x9e   : > { %v353_v29 = vpop.permute.xlu0 %352  ;;  %v285_v42 = vsel %vm270_vm1, 0.0, %v284_v40  ;;  %v286_v43 = vsel %vm271_vm2, 0.0, %v283_v39  ;;  %v329_v5 = vpop.permute.xlu2 %328 }
  0x9f   : > { %v357_v30 = vperm.slane %v353_v29, %v315_v19  ;;  %v349_v48 = vmul.f32 %v347_v16, %v285_v42  ;;  %v350_v49 = vmul.f32 %v347_v16, %v286_v43 }
  0xa1   : > { %v321_v31 = vld.sshfl [vmem:[#allocation1] sm:$0xff pattern:$0x75316420]  ;;  %v322_v32 = vld.sshfl [vmem:[#allocation1 + $0x8] sm:$0xff pattern:$0x75316420]  ;;  %v359_v33 = vmul.f32 %v357_v30, %v911_v4 }
  0xa3   : > { %361 = vst [vmem:[#allocation1] ss:$2 sm:$0xff] %v359_v33 }
  0xa4   : > { %v297_v38 = vpop.permute.xlu1 %296 }
  0xa5   : > { %v299_v44 = vsel %vm298_vm3, %v295_v34, %v297_v38  ;;  %v300_v45 = vsel %vm298_vm3, %v297_v38, %v295_v34 }
  0xa6   : > { %v301_v51 = vsel %vm287_vm4, 0.0, %v299_v44  ;;  %v302_v52 = vsel %vm288_vm5, 0.0, %v300_v45 }
  0xa7   : > { %v390_v58 = vpop.permute.xlu0 %389  ;;  %v415_v3 = vmul.f32 %v413_v50, %v301_v51  ;;  %v416_v4 = vmul.f32 %v413_v50, %v302_v52  ;;  %v331_v11 = vmul.f32 %v329_v5, %v301_v51  ;;  %v332_v12 = vmul.f32 %v329_v5, %v302_v52 }
  0xa8   : > { %v392_v61 = vmul.f32 %v390_v58, %v285_v42  ;;  %v393_v62 = vmul.f32 %v390_v58, %v286_v43 }
  0xaa   : > { %v362_v46 = vld.sshfl [vmem:[#allocation1] sm:$0xff pattern:$0x75316420]  ;;  %v363_v47 = vld.sshfl [vmem:[#allocation1 + $0x8] sm:$0xff pattern:$0x75316420] }
  0xab   : > { %404 = vst [vmem:[#allocation1] ss:$2 sm:$0xff] %v402_v41  ;;  %v366_v54 = vadd.f32 %v362_v46, %v349_v48  ;;  %v367_v55 = vadd.f32 %v363_v47, %v350_v49 }
  0xac   : > { %v370_v53 = vpop.permute.xlu1 %369 }
  0xad   : > { %v372_v56 = vmul.f32 %v370_v53, %v301_v51  ;;  %v373_v57 = vmul.f32 %v370_v53, %v302_v52 }
  0xaf   : > { %v374_v59 = vadd.f32 %v372_v56, %v366_v54  ;;  %v375_v60 = vadd.f32 %v373_v57, %v367_v55 }
  0xb0   : > { %v339_v19 = vpop.permute.xlu0 %338 }
  0xb1   : > { %378 = vrot.lane.b32.xlu2 %v375_v60, %s802_s4  ;;  %376 = vrot.lane.b32.xlu1 %v374_v59, %s802_s4 }
  0xb2   : > { %v405_v63 = vld.sshfl [vmem:[#allocation1] sm:$0xff pattern:$0x75316420]  ;;  %v406_v0 = vld.sshfl [vmem:[#allocation1 + $0x8] sm:$0xff pattern:$0x75316420] }
  0xb3   : > { %v409_v1 = vadd.f32 %v405_v63, %v392_v61  ;;  %v410_v2 = vadd.f32 %v406_v0, %v393_v62 }
  0xb5   : > { %v306_v6 = vpop.permute.xlu1 %305  ;;  %v418_v9 = vadd.f32 %v416_v4, %v410_v2  ;;  %v417_v10 = vadd.f32 %v415_v3, %v409_v1 }
  0xb6   : > { %v308_v7 = vmul.f32 %v306_v6, %v285_v42  ;;  %v309_v8 = vmul.f32 %v306_v6, %v286_v43 }
  0xb8   : > { %v325_v13 = vadd.f32 %v321_v31, %v308_v7  ;;  %v326_v14 = vadd.f32 %v322_v32, %v309_v8 }
  0xb9   : > { %421 = vrot.lane.b32.xlu2 %v418_v9, %s803_s5  ;;  %419 = vrot.lane.b32.xlu1 %v417_v10, %s803_s5 }
  0xba   : > { %v333_v15 = vadd.f32 %v331_v11, %v325_v13  ;;  %v334_v16 = vadd.f32 %v332_v12, %v326_v14 }
  0xbc   : > { %v342_v22 = vadd.f32 %v339_v19, %v334_v16  ;;  %v341_v27 = vadd.f32 %v339_v19, %v333_v15 }
 0x10b   : > { %v379_v17 = vpop.permute.xlu2 %378 }
 0x113   : > { %v422_v23 = vpop.permute.xlu2 %421 }
 0x123   : > { %v377_v18 = vpop.permute.xlu1 %376 }
 0x124   : > { %v381_v20 = vsel %vm343_vm6, %v379_v17, %v377_v18  ;;  %v380_v21 = vsel %vm343_vm6, %v377_v18, %v379_v17 }
 0x125   : > { %v382_v24 = vsel %vm343_vm6, 0.0, %v381_v20  ;;  %v385_v29 = vadd.f32 %v380_v21, %v342_v22 }
 0x126   : > { %v384_v33 = vadd.f32 %v382_v24, %v341_v27 }
 0x12b   : > { %v420_v25 = vpop.permute.xlu1 %419 }
 0x12c   : > { %v425_v30 = vsel %vm423_vm7, %v422_v23, %v420_v25  ;;  %v424_v31 = vsel %vm423_vm7, %v420_v25, %v422_v23 }
 0x12d   : > { %v427_v32 = vsel %vm387_vm8, 0.0, %v425_v30  ;;  %v428_v26 = vadd.f32 %v424_v31, %v384_v33 }
 0x12e   : > { %v429_v34 = vadd.f32 %v427_v32, %v385_v29 }
 0x130   : > { %v432_v28 = vrot.slane %v429_v34, 4 }
 0x132   : > { %v434_v35 = vsel %vm433_vm9, %v428_v26, %v432_v28 }
 0x133   : > { %436 = vst [vmem:[%s232_s15] sm:$0xff] %v434_v35 }
 0x134   : > { %733 = shalt.err (!%p730_p13)
}
 0x135   : > { %591 = dma.vmem_to_hbm [thread:$0]  (%p875_p9), %s454_s10, 128, %s456_s19, %s438_s21  }
 0x136 PF: > { %s467_s11 = sand.u32 1, %s768_s12   ;;  %p598_p0 = pnand %p575_p12, %p882_p11 }
 0x137   : > { %s468_s4 = scalar_lea.sflag [#allocation4], %s467_s11 }
 0x138   : > { %p599_p1 = pneg %p598_p0 }
 0x13a   : > { %763 = dma.done.wait (%p599_p1), %s468_s4, 128  }
 0x13b   : > { %765 = vsyncadd (%p599_p1), %s468_s4, 4294967168  ;;  %s19_s17 = sadd.s32 1, %s788_s17   ;;  %s981_s12 = smov %s772_s13 }
 0x13c   : > { %p16_p2 = scmp.ge.s32.totalorder %s19_s17, 4   ;;  %s982_s13 = smov %s776_s14 }
 0x13d   : > { %s983_s14 = smov %s880_s26  ;;  %s984_s15 = smov %s784_s16 }
 0x13e   : > { %s985_s16 = smov %s987_s20  ;;  %18 = sbr.rel (!%p16_p2) target bundleno = 6 (0x6), region = 83 }
 0x143   :  { %474 = vsyncpa [#allocation3], 1 }
 0x144   :  { %476 = vsyncpa [#allocation3 + $0x1], 1 }
 0x145   :  { %477 = vsyncpa [#allocation4], 1 }
 0x146   :  { %479 = vsyncpa [#allocation4 + $0x1], 1 }

</bundles_post_ra>
